<compile_context>
chip_gen: v6e
topology: v6e:2x2x1
jax: 0.10.0
libtpu: 0.0.40
codegen_flags: <defaults>
</compile_context>

<pallas_src>
import math
import numpy as np
import jax
import jax.numpy as jnp
from jax.experimental import pallas as pl
from jax.experimental.pallas import tpu as pltpu


# ----------------------------------------------------------------------------
# Spectral filters (numpy eigh, as in the reference).
# ----------------------------------------------------------------------------
def nearest_power_of_two(x: int, round_up: bool = False) -> int:
    return 1 << math.floor(math.log2(x)) if not round_up else 1 << math.ceil(math.log2(x))


def get_hankel(seq_len: int, use_hankel_L: bool = False) -> np.ndarray:
    entries = np.arange(1, seq_len + 1, dtype=np.float64)
    i_plus_j = entries[:, None] + entries[None, :]
    if use_hankel_L:
        sgn = (-1.0) ** (i_plus_j - 2.0) + 1.0
        denom = (i_plus_j + 3.0) * (i_plus_j - 1.0) * (i_plus_j + 1.0)
        Z = sgn * (8.0 / denom)
    else:
        Z = 2.0 / (i_plus_j ** 3 - i_plus_j)
    return Z


def get_spectral_filters(seq_len: int, K: int, use_hankel_L: bool = False) -> np.ndarray:
    Z = get_hankel(seq_len, use_hankel_L)
    sigma, phi = np.linalg.eigh(Z)
    sigma_k, phi_k = sigma[-K:], phi[:, -K:]
    phi_k = phi_k * sigma_k ** 0.25
    return phi_k.astype(np.float32)          # (seq_len, K)


# ----------------------------------------------------------------------------
# Stacks for the batch-folded Toeplitz formulation.
# ----------------------------------------------------------------------------
def build_spectral_stacks(phi, M_phi_plus, M_phi_minus, use_hankel_L, bsz):
    """Toeplitz stack (n_spec, L, L) and block-diagonal mixing stack
    (n_spec, bsz*d_in, bsz*d_out) matching the batch-folded x layout."""
    L, K = phi.shape
    t = np.arange(L)
    lag = t[:, None] - t[None, :]              # lag[t, s] = t - s
    causal = lag >= 0
    lag_c = np.clip(lag, 0, L - 1)

    # T_plus[k, t, s] = phi[t-s, k]   (t >= s)
    T_plus = np.where(causal[None], phi.T[:, lag_c], 0.0)
    Ts, Ms = [T_plus], [np.asarray(M_phi_plus)]
    if not use_hankel_L:
        # T_minus[k, t, s] = (-1)^(t-s) phi[t-s, k]   (t >= s)
        alt = (-1.0) ** np.arange(L)
        T_minus = np.where(causal[None], (phi * alt[:, None]).T[:, lag_c], 0.0)
        Ts.append(T_minus)
        Ms.append(np.asarray(M_phi_minus))

    T_spec = np.concatenate(Ts, axis=0).astype(np.float32)          # (n_spec, L, L)
    M_spec = np.concatenate(Ms, axis=0).astype(np.float32)          # (n_spec, d_in, d_out)
    eye = np.eye(bsz, dtype=np.float32)
    M_block = np.stack([np.kron(eye, Mk) for Mk in M_spec], axis=0)  # (n_spec, B*d_in, B*d_out)
    return T_spec, M_block


def build_ar_stacks(x_f, M, bsz):
    """Shifted-x stack (k_u, L, B*d_in) and block-diagonal AR mixing stack
    (k_u, B*d_in, B*d_out).  Replaces the (L,L) shift-matrix matmuls."""
    d_out, d_in, k_u = M.shape
    L = x_f.shape[0]
    shifted = [x_f if i == 0 else jnp.pad(x_f, ((i, 0), (0, 0)))[:L] for i in range(k_u)]
    X_ar = jnp.stack(shifted, axis=0).astype(jnp.float32)
    eye = np.eye(bsz, dtype=np.float32)
    M_ar = np.stack([np.kron(eye, M[:, :, i].T) for i in range(k_u)], axis=0)
    return X_ar, jnp.asarray(M_ar, dtype=jnp.float32)


# ----------------------------------------------------------------------------
# Pallas kernel:  out_f += T[k, t_tile, s_tile] @ x_f[s_tile] @ M_block[k]
#                 (+ AR init once per row tile)
# ----------------------------------------------------------------------------
def make_stu_kernel(k_u, lt, ls):
    def stu_kernel(t_ref, xs_ref, m_ref, xar_ref, mar_ref, o_ref):
        ti = pl.program_id(0)   # output row tile
        k = pl.program_id(1)    # spectral term
        si = pl.program_id(2)   # contraction column tile

        # Initialize the VMEM-resident output block with the AR contribution.
        @pl.when((k == 0) & (si == 0))
        def _init():
            acc = jnp.zeros(o_ref.shape, jnp.float32)
            for i in range(k_u):
                acc = acc + jnp.dot(xar_ref[i], mar_ref[i],
                                    preferred_element_type=jnp.float32)
            o_ref[...] = acc

        # Spectral term; skip blocks strictly above the diagonal (T is lower
        # triangular, those blocks are all zero).
        @pl.when(si * ls < (ti + 1) * lt)
        def _spectral():
            u = jnp.dot(t_ref[0], xs_ref[...],
                        preferred_element_type=jnp.float32)           # (lt, B*d_in)
            o_ref[...] += jnp.dot(u, m_ref[0],
                                  preferred_element_type=jnp.float32)  # (lt, B*d_out)

    return stu_kernel


def _pick_tile(L, target=512):
    if L <= target:
        return L
    t = (target // 128) * 128
    while t >= 128:
        if L % t == 0:
            return t
        t -= 128
    return L


def stu_forward_pallas(x_f_bf, T_spec_bf, M_block, X_ar, M_ar_block, bsz):
    """x_f_bf: (L, B*d_in) bf16; T_spec_bf: (n_spec, L, L) bf16;
    M_block: (n_spec, B*d_in, B*d_out) f32; X_ar: (k_u, L, B*d_in) f32;
    M_ar_block: (k_u, B*d_in, B*d_out) f32.  Returns (B, L, d_out) f32."""
    L, bd_in = x_f_bf.shape
    n_spec = T_spec_bf.shape[0]
    k_u = M_ar_block.shape[0]
    bd_out = M_block.shape[2]
    d_out = bd_out // bsz

    lt = _pick_tile(L)
    ls = _pick_tile(L)
    grid = (L // lt, n_spec, L // ls)

    out_f = pl.pallas_call(
        make_stu_kernel(k_u, lt, ls),
        out_shape=jax.ShapeDtypeStruct((L, bd_out), jnp.float32),
        grid_spec=pltpu.PrefetchScalarGridSpec(
            num_scalar_prefetch=0,
            grid=grid,
            in_specs=[
                pl.BlockSpec((1, lt, ls), lambda ti, k, si: (k, ti, si)),       # Toeplitz tile
                pl.BlockSpec((ls, bd_in), lambda ti, k, si: (si, 0)),           # folded x tile
                pl.BlockSpec((1, bd_in, bd_out), lambda ti, k, si: (k, 0, 0)),  # mixing of term k
                pl.BlockSpec((k_u, lt, bd_in), lambda ti, k, si: (0, ti, 0)),   # shifted x rows
                pl.BlockSpec((k_u, bd_in, bd_out), lambda ti, k, si: (0, 0, 0)),# AR mixing
            ],
            out_specs=pl.BlockSpec((lt, bd_out), lambda ti, k, si: (ti, 0)),
        ),
        compiler_params=pltpu.CompilerParams(
            dimension_semantics=("parallel", "arbitrary", "arbitrary"),
            vmem_limit_bytes=48 * 1024 * 1024),
    )(T_spec_bf, x_f_bf, M_block, X_ar, M_ar_block)

    return jnp.transpose(out_f.reshape(L, bsz, d_out), (1, 0, 2))


# ----------------------------------------------------------------------------
# Pure-JAX reference (mirrors the PyTorch FFT path) for a correctness check.
# ----------------------------------------------------------------------------
def convolve_ref(u, v, n):
    bsz, L, d_in = u.shape
    K = v.shape[1]
    sgn = np.ones((1, L, 1, 1), dtype=np.float32)
    sgn[:, 1::2] *= -1.0
    sgn = jnp.asarray(sgn)                                  # (1, L, 1, 1)
    v_ = v.reshape(1, L, K, 1, 1).astype(jnp.float32)
    u_ = jnp.broadcast_to(u.reshape(bsz, L, 1, d_in), (bsz, L, K, d_in))
    V = jnp.fft.rfft(v_, n=n, axis=1)
    U = jnp.stack([u_, u_ * sgn], axis=-1).astype(jnp.float32)
    Uf = jnp.fft.rfft(U, n=n, axis=1)
    U_conv = jnp.fft.irfft(V * Uf, n=n, axis=1)[:, :L]
    U_plus, U_minus = U_conv[..., 0], U_conv[..., 1]
    U_minus = U_minus * sgn                                 # 4-D broadcast, as in torch
    return U_plus, U_minus


def stu_forward_ref(x, phi, M, Mp, Mm, n, use_hankel_L, k_u):
    bsz, L, d_in = x.shape
    d_out = M.shape[0]
    U_plus, U_minus = convolve_ref(x, phi, n)
    spectral_plus = jnp.einsum('btkj,kjo->bto', U_plus, Mp)
    spectral_minus = jnp.einsum('btkj,kjo->bto', U_minus, Mm)
    output = spectral_plus if use_hankel_L else spectral_plus + spectral_minus
    ar = jnp.zeros((bsz, L, d_out), jnp.float32)
    for i in range(k_u):
        xi = jnp.pad(x, ((0, 0), (i, 0), (0, 0)))[:, :L]     # x[b, t-i] (zero for t<i)
        ar = ar + jnp.einsum('btj,oj->bto', xi, M[:, :, i])
    return output + ar


# ----------------------------------------------------------------------------
if __name__ == "__main__":
    config = dict(seq_len=64, num_eigh=8, d_in=16, d_out=16, k_u=3, use_hankel_L=True)
    bsz = 2
    L, K, d_in, d_out, k_u = (config["seq_len"], config["num_eigh"],
                              config["d_in"], config["d_out"], config["k_u"])
    use_hankel_L = config["use_hankel_L"]
    n = nearest_power_of_two(L * 2 - 1, round_up=True)

    # Deterministic parameters (same shapes / scaling as the nn.Module __init__).
    key = jax.random.PRNGKey(0)
    kx, kM, kp, km = jax.random.split(key, 4)
    x = jax.random.normal(kx, (bsz, L, d_in), jnp.float32)
    M = np.asarray(jax.random.normal(kM, (d_out, d_in, k_u), jnp.float32)) / d_in
    M_phi_plus = np.asarray(jax.random.normal(kp, (K, d_in, d_out), jnp.float32)) / 10.0
    M_phi_minus = np.asarray(jax.random.normal(km, (K, d_in, d_out), jnp.float32)) / 10.0

    phi = get_spectral_filters(L, K, use_hankel_L)              # (L, K) float32

    # bf16-round the streamed operands (kernel uses them in bf16); feed the
    # same rounded values to the reference so the check isolates kernel math.
    phi_q = np.asarray(jnp.asarray(phi).astype(jnp.bfloat16).astype(jnp.float32))
    x_q32 = x.astype(jnp.bfloat16).astype(jnp.float32)

    # TODO(synk): compute_ar_x_preds is not defined in the source file; the
    # standard flash-STU definition (causal AR with kernel length k_u) is used.
    T_spec, M_block = build_spectral_stacks(phi_q, M_phi_plus, M_phi_minus,
                                            use_hankel_L, bsz)
    T_spec_bf = jnp.asarray(T_spec).astype(jnp.bfloat16)         # (n_spec, L, L)
    M_block = jnp.asarray(M_block)                               # f32 (tiny)

    x_f32 = jnp.transpose(x_q32, (1, 0, 2)).reshape(L, bsz * d_in)   # (L, B*d_in)
    x_f_bf = x_f32.astype(jnp.bfloat16)
    X_ar, M_ar_block = build_ar_stacks(x_f32, M, bsz)

    out = stu_forward_pallas(x_f_bf, T_spec_bf, M_block, X_ar, M_ar_block, bsz)
    out = jax.block_until_ready(out)

    ref = stu_forward_ref(x_q32, jnp.asarray(phi_q), jnp.asarray(M),
                          jnp.asarray(M_phi_plus), jnp.asarray(M_phi_minus),
                          n, use_hankel_L, k_u)
    ref = jax.block_until_ready(ref)

    np.testing.assert_allclose(np.asarray(out), np.asarray(ref), rtol=5e-3, atol=5e-3)
    print("KERNEL_OK")
</pallas_src>

<mosaic_0001>
module attributes {stable_mosaic.version = 11 : i64} {
  func.func @stu_kernel(%arg0: i32, %arg1: i32, %arg2: i32, %arg3: memref<1x64x64xbf16, #tpu.memory_space<vmem>>, %arg4: memref<64x32xbf16, #tpu.memory_space<vmem>>, %arg5: memref<1x32x32xf32, #tpu.memory_space<vmem>>, %arg6: memref<3x64x32xf32, #tpu.memory_space<vmem>>, %arg7: memref<3x32x32xf32, #tpu.memory_space<vmem>>, %arg8: memref<64x32xf32, #tpu.memory_space<vmem>>) attributes {dimension_semantics = [#tpu.dimension_semantics<parallel>, #tpu.dimension_semantics<arbitrary>, #tpu.dimension_semantics<arbitrary>], iteration_bounds = array<i64: 1, 8, 1>, scalar_prefetch = 0 : i64, scratch_operands = 0 : i64, tpu.core_type = #tpu.core_type<tc>, window_params = [{transform_indices = @transform_0, window_bounds = array<i64: 1, 64, 64>}, {transform_indices = @transform_1, window_bounds = array<i64: 64, 32>}, {transform_indices = @transform_2, window_bounds = array<i64: 1, 32, 32>}, {transform_indices = @transform_3, window_bounds = array<i64: 3, 64, 32>}, {pipeline_mode = #tpu.pipeline_mode<synchronous>, transform_indices = @transform_4, window_bounds = array<i64: 3, 32, 32>}, {transform_indices = @transform_5, window_bounds = array<i64: 64, 32>}]} {
    %c0_i32 = arith.constant 0 : i32
    %0 = arith.cmpi eq, %arg1, %c0_i32 : i32
    %c0_i32_0 = arith.constant 0 : i32
    %1 = arith.cmpi eq, %arg2, %c0_i32_0 : i32
    %2 = arith.andi %0, %1 : i1
    %3 = arith.extui %2 : i1 to i32
    %c0_i32_1 = arith.constant 0 : i32
    %4 = arith.cmpi ne, %3, %c0_i32_1 : i32
    scf.if %4 {
      %cst = arith.constant 0.000000e+00 : f32
      %11 = vector.broadcast %cst : f32 to vector<64x32xf32>
      %c0 = arith.constant 0 : index
      %c0_4 = arith.constant 0 : index
      %c0_5 = arith.constant 0 : index
      %12 = vector.load %arg6[%c0, %c0_4, %c0_5] : memref<3x64x32xf32, #tpu.memory_space<vmem>>, vector<1x64x32xf32>
      %13 = vector.shape_cast %12 : vector<1x64x32xf32> to vector<64x32xf32>
      %c0_6 = arith.constant 0 : index
      %c0_7 = arith.constant 0 : index
      %c0_8 = arith.constant 0 : index
      %14 = vector.load %arg7[%c0_6, %c0_7, %c0_8] : memref<3x32x32xf32, #tpu.memory_space<vmem>>, vector<1x32x32xf32>
      %15 = vector.shape_cast %14 : vector<1x32x32xf32> to vector<32x32xf32>
      %cst_9 = arith.constant dense<0.000000e+00> : vector<64x32xf32>
      %16 = tpu.matmul %13, %15, %cst_9 {dimension_numbers = #tpu.dot_dimension_numbers<[1], [0], [0], [1], [0, 0, 1, 1], [], []>} : vector<64x32xf32>, vector<32x32xf32>, vector<64x32xf32> -> vector<64x32xf32>
      %17 = arith.addf %11, %16 : vector<64x32xf32>
      %c1 = arith.constant 1 : index
      %c0_10 = arith.constant 0 : index
      %c0_11 = arith.constant 0 : index
      %18 = vector.load %arg6[%c1, %c0_10, %c0_11] : memref<3x64x32xf32, #tpu.memory_space<vmem>>, vector<1x64x32xf32>
      %19 = vector.shape_cast %18 : vector<1x64x32xf32> to vector<64x32xf32>
      %c1_12 = arith.constant 1 : index
      %c0_13 = arith.constant 0 : index
      %c0_14 = arith.constant 0 : index
      %20 = vector.load %arg7[%c1_12, %c0_13, %c0_14] : memref<3x32x32xf32, #tpu.memory_space<vmem>>, vector<1x32x32xf32>
      %21 = vector.shape_cast %20 : vector<1x32x32xf32> to vector<32x32xf32>
      %cst_15 = arith.constant dense<0.000000e+00> : vector<64x32xf32>
      %22 = tpu.matmul %19, %21, %cst_15 {dimension_numbers = #tpu.dot_dimension_numbers<[1], [0], [0], [1], [0, 0, 1, 1], [], []>} : vector<64x32xf32>, vector<32x32xf32>, vector<64x32xf32> -> vector<64x32xf32>
      %23 = arith.addf %17, %22 : vector<64x32xf32>
      %c2 = arith.constant 2 : index
      %c0_16 = arith.constant 0 : index
      %c0_17 = arith.constant 0 : index
      %24 = vector.load %arg6[%c2, %c0_16, %c0_17] : memref<3x64x32xf32, #tpu.memory_space<vmem>>, vector<1x64x32xf32>
      %25 = vector.shape_cast %24 : vector<1x64x32xf32> to vector<64x32xf32>
      %c2_18 = arith.constant 2 : index
      %c0_19 = arith.constant 0 : index
      %c0_20 = arith.constant 0 : index
      %26 = vector.load %arg7[%c2_18, %c0_19, %c0_20] : memref<3x32x32xf32, #tpu.memory_space<vmem>>, vector<1x32x32xf32>
      %27 = vector.shape_cast %26 : vector<1x32x32xf32> to vector<32x32xf32>
      %cst_21 = arith.constant dense<0.000000e+00> : vector<64x32xf32>
      %28 = tpu.matmul %25, %27, %cst_21 {dimension_numbers = #tpu.dot_dimension_numbers<[1], [0], [0], [1], [0, 0, 1, 1], [], []>} : vector<64x32xf32>, vector<32x32xf32>, vector<64x32xf32> -> vector<64x32xf32>
      %29 = arith.addf %23, %28 : vector<64x32xf32>
      %c0_22 = arith.constant 0 : index
      %c0_23 = arith.constant 0 : index
      %30 = vector.load %arg8[%c0_22, %c0_23] : memref<64x32xf32, #tpu.memory_space<vmem>>, vector<64x32xf32>
      tpu.vector_store %arg8[%c0_22, %c0_23], %29 {strides = array<i32>} : memref<64x32xf32, #tpu.memory_space<vmem>>, vector<64x32xf32>,
    } else {
    }
    %c64_i32 = arith.constant 64 : i32
    %5 = arith.muli %arg2, %c64_i32 : i32
    %c1_i32 = arith.constant 1 : i32
    %6 = arith.addi %arg0, %c1_i32 : i32
    %c64_i32_2 = arith.constant 64 : i32
    %7 = arith.muli %6, %c64_i32_2 : i32
    %8 = arith.cmpi slt, %5, %7 : i32
    %9 = arith.extui %8 : i1 to i32
    %c0_i32_3 = arith.constant 0 : i32
    %10 = arith.cmpi ne, %9, %c0_i32_3 : i32
    scf.if %10 {
      %c0 = arith.constant 0 : index
      %c0_4 = arith.constant 0 : index
      %c0_5 = arith.constant 0 : index
      %11 = vector.load %arg3[%c0, %c0_4, %c0_5] : memref<1x64x64xbf16, #tpu.memory_space<vmem>>, vector<1x64x64xbf16>
      %12 = vector.shape_cast %11 : vector<1x64x64xbf16> to vector<64x64xbf16>
      %c0_6 = arith.constant 0 : index
      %c0_7 = arith.constant 0 : index
      %13 = vector.load %arg4[%c0_6, %c0_7] : memref<64x32xbf16, #tpu.memory_space<vmem>>, vector<64x32xbf16>
      %cst = arith.constant dense<0.000000e+00> : vector<64x32xf32>
      %14 = tpu.matmul %12, %13, %cst {dimension_numbers = #tpu.dot_dimension_numbers<[1], [0], [0], [1], [0, 0, 1, 1], [], []>} : vector<64x64xbf16>, vector<64x32xbf16>, vector<64x32xf32> -> vector<64x32xf32>
      %c0_8 = arith.constant 0 : index
      %c0_9 = arith.constant 0 : index
      %15 = vector.load %arg8[%c0_8, %c0_9] : memref<64x32xf32, #tpu.memory_space<vmem>>, vector<64x32xf32>
      %c0_10 = arith.constant 0 : index
      %c0_11 = arith.constant 0 : index
      %c0_12 = arith.constant 0 : index
      %16 = vector.load %arg5[%c0_10, %c0_11, %c0_12] : memref<1x32x32xf32, #tpu.memory_space<vmem>>, vector<1x32x32xf32>
      %17 = vector.shape_cast %16 : vector<1x32x32xf32> to vector<32x32xf32>
      %cst_13 = arith.constant dense<0.000000e+00> : vector<64x32xf32>
      %18 = tpu.matmul %14, %17, %cst_13 {dimension_numbers = #tpu.dot_dimension_numbers<[1], [0], [0], [1], [0, 0, 1, 1], [], []>} : vector<64x32xf32>, vector<32x32xf32>, vector<64x32xf32> -> vector<64x32xf32>
      %19 = arith.addf %15, %18 : vector<64x32xf32>
      %c0_14 = arith.constant 0 : index
      %c0_15 = arith.constant 0 : index
      %20 = vector.load %arg8[%c0_14, %c0_15] : memref<64x32xf32, #tpu.memory_space<vmem>>, vector<64x32xf32>
      tpu.vector_store %arg8[%c0_14, %c0_15], %19 {strides = array<i32>} : memref<64x32xf32, #tpu.memory_space<vmem>>, vector<64x32xf32>,
    } else {
    }
    return
  }
  func.func @transform_0(%arg0: i32, %arg1: i32, %arg2: i32) -> (i32, i32, i32) {
    %c0_i32 = arith.constant 0 : i32
    return %arg1, %arg0, %arg2 : i32, i32, i32
  }
  func.func @transform_1(%arg0: i32, %arg1: i32, %arg2: i32) -> (i32, i32) {
    %c0_i32 = arith.constant 0 : i32
    %c0_i32_0 = arith.constant 0 : i32
    return %arg2, %c0_i32 : i32, i32
  }
  func.func @transform_2(%arg0: i32, %arg1: i32, %arg2: i32) -> (i32, i32, i32) {
    %c0_i32 = arith.constant 0 : i32
    %c0_i32_0 = arith.constant 0 : i32
    %c0_i32_1 = arith.constant 0 : i32
    return %arg1, %c0_i32, %c0_i32_0 : i32, i32, i32
  }
  func.func @transform_3(%arg0: i32, %arg1: i32, %arg2: i32) -> (i32, i32, i32) {
    %c0_i32 = arith.constant 0 : i32
    %c0_i32_0 = arith.constant 0 : i32
    %c0_i32_1 = arith.constant 0 : i32
    return %c0_i32, %arg0, %c0_i32_0 : i32, i32, i32
  }
  func.func @transform_4(%arg0: i32, %arg1: i32, %arg2: i32) -> (i32, i32, i32) {
    %c0_i32 = arith.constant 0 : i32
    %c0_i32_0 = arith.constant 0 : i32
    %c0_i32_1 = arith.constant 0 : i32
    %c0_i32_2 = arith.constant 0 : i32
    return %c0_i32, %c0_i32_0, %c0_i32_1 : i32, i32, i32
  }
  func.func @transform_5(%arg0: i32, %arg1: i32, %arg2: i32) -> (i32, i32) {
    %c0_i32 = arith.constant 0 : i32
    %c0_i32_0 = arith.constant 0 : i32
    return %arg0, %c0_i32 : i32, i32
  }
}

</mosaic_0001>

<bundles_post_ra>
// kernel: tpu_custom_call.1
= control target key start
LH: loop header
LB: loop body
LE: loop exit
PB: predicated region body
PF: predicated region fallthrough
CT: control target
= control target key end

     0   :  { %10 = vsyncpa [#allocation3], 0  ;;  %s2072_s0 = inlined_call_operand.vmem [shape: bf16[8,64,64], index: 0, kind: input, shape index: {}]   ;;  %s2073_s1 = inlined_call_operand.vmem [shape: bf16[64,32], index: 1, kind: input, shape index: {}]   ;;  %s2074_s2 = inlined_call_operand.hbm [shape: f32[8,32,32], index: 2, kind: input, shape index: {}]   ;;  %s2075_s3 = inlined_call_operand.vmem [shape: f32[3,64,32], index: 3, kind: input, shape index: {}]   ;;  %s2076_s4 = inlined_call_operand.hbm [shape: f32[3,32,32], index: 4, kind: input, shape index: {}]   ;;  %s2077_s5 = inlined_call_operand.vmem [shape: f32[64,32], index: 5, kind: output, shape index: {}]  }
   0x1   :  { %12 = vsyncpa [#allocation3 + $0x1], 0 }
   0x2   :  { %13 = vsyncpa [#allocation5], 0  ;;  %s1724_s18 = smov 0   ;;  %s1726_s19 = smov 0  }
   0x3   :  { %s1728_s20 = smov 0   ;;  %s1730_s21 = smov 0  }
   0x4   :  { %s1732_s22 = smov 0   ;;  %s1734_s23 = smov 0  }
   0x5 LB: > { %s1262_s24 = sadd.s32 4294967295, %s1688_s23   ;;  %p114_p0 = scmp.ne.s32.totalorder %s1672_s19, %s1668_s18  ;;  %s1688_s23 = sphi %s1734_s23, %s19_s23   ;;  %s1684_s22 = sphi %s1732_s22, %s2087_s22   ;;  %s1680_s21 = sphi %s1730_s21, %s2086_s21   ;;  %s1676_s20 = sphi %s1728_s20, %s2085_s20   ;;  %s1672_s19 = sphi %s1726_s19, %s2084_s19   ;;  %s1668_s18 = sphi %s1724_s18, %s2083_s18  }
   0x6   : > { %p1754_p1 = scmp.eq.s32.totalorder %s1262_s24, 0  ;;  %p1263_p2 = scmp.ge.s32.totalorder %s1688_s23, 1 }
   0x7   : > { %p198_p3 = scmp.lt.s32.totalorder %s1688_s23, 9  ;;  %s1690_s28 = smov [#allocation4]  }
   0x8   : > { %p1762_p4 = por %p1754_p1, %p114_p0  ;;  %s228_s29 = sshll.u32 %s1690_s28, 4  ;;  %s229_s29 = int_to_ptr.vmem [resolvable:$true] %s228_s29 }
   0x9   : > { %p1766_p5 = pnand %p1263_p2, %p198_p3  ;;  %s34_s6 = sadd.s32 1, %s1684_s22 }
   0xa   : > { %s1591_s7 = scalar_lea.vmem %s229_s29, 1536  ;;  %p1599_p12 = scmp.lt.s32.totalorder %s229_s29, %s229_s29 }
   0xb   : > { %p1510_p6 = pneg %p1766_p5  ;;  %p1592_p9 = scmp.ne.s32.totalorder %s229_s29, %s1591_s7 }
   0xc   : > { %p1600_p13 = scmp.lt.s32.totalorder %s1591_s7, %s1591_s7 }
   0xd   : > { %p1774_p7 = pnand %p1510_p6, %p1754_p1 }
   0xe   : > { %p1601_p0 = por %p1600_p13, %p1599_p12 }
   0xf   : > { %p1582_p8 = pneg %p1774_p7 }
  0x11   : > { %p1594_p10 = pnand %p1592_p9, %p1582_p8 }
  0x13   : > { %p1595_p11 = pneg %p1594_p10 }
  0x15   : > { %p1602_p2 = pnand %p1601_p0, %p1595_p11 }
  0x17   : > { %1605 = shalt.err (!%p1602_p2)
}
  0x18   : > { %s1691_s8 = smov 128   ;;  %s1692_s9 = smov 8  }
  0x19   : > { %1513 = dma.hbm_to_vmem [thread:$0]  (!%p1774_p7), %s2076_s4, 1536, %s229_s29, [#allocation5], %s1691_s8, %s1691_s8, %s1692_s9  }
  0x1a   : > { %p36_p3 = scmp.ge.s32.totalorder %s34_s6, 8  ;;  %s101_s12 = sadd.s32 1, %s1676_s20 }
  0x1b   : > { %p108_p6 = scmp.ne.s32.totalorder %s1676_s20, %s1672_s19  ;;  %p109_p8 = scmp.eq.s32.totalorder %s1688_s23, 0 }
  0x1c   : > { %s2089_s6 = smov (%p36_p3, %s34_s6), 0  ;;  %p1519_p10 = scmp.lt.s32.totalorder %s1688_s23, 8 }
  0x1d   : > { %p110_p9 = por %p109_p8, %p108_p6  ;;  %s98_s13 = ssub.s32 %s1684_s22, %s2089_s6 }
  0x1e   : > { %s258_s14 = sand.u32 1, %s1676_s20   ;;  %p99_p11 = scmp.eq.s32.totalorder %s98_s13, 0 }
  0x1f   : > { %s1268_s15 = sshll.u32 %s258_s14, 5  ;;  %s1341_s16 = sshll.u32 %s1684_s22, 9 }
  0x20   : > { %s1801_s17 = scalar_select %p99_p11, %s1676_s20, %s101_s12  }
  0x21   : > { %s268_s28 = scalar_lea.hbm %s2074_s2, %s1341_s16  ;;  %s262_s29 = scalar_lea.vmem [#allocation2], %s1268_s15 }
  0x22   : > { %s269_s30 = sshll.u32 %s262_s29, 4  ;;  %p1806_p7 = pnand %p1519_p10, %p110_p9  ;;  %s270_s30 = int_to_ptr.vmem [resolvable:$true] %s269_s30 }
  0x23   : > { %s259_s10 = scalar_lea.sflag [#allocation3], %s258_s14  ;;  %s1619_s11 = scalar_lea.vmem %s270_s30, 512 }
  0x24   : > { %p1608_p12 = pneg %p1806_p7  ;;  %p1620_p13 = scmp.ne.s32.totalorder %s270_s30, %s1619_s11 }
  0x25   : > { %s1693_s12 = smov [#allocation2]  }
  0x26   : > { %p1622_p0 = pnand %p1620_p13, %p1608_p12  ;;  %s1624_s13 = sshll.u32 %s1693_s12, 4  ;;  %s1625_s13 = int_to_ptr.vmem [resolvable:$false] %s1624_s13 }
  0x27   : > { %s1626_s18 = scalar_lea.vmem %s1625_s13, 1024  ;;  %p1627_p3 = scmp.lt.s32.totalorder %s270_s30, %s1625_s13 }
  0x28   : > { %p1623_p2 = pneg %p1622_p0  ;;  %p1628_p6 = scmp.lt.s32.totalorder %s1626_s18, %s1619_s11 }
  0x2a   : > { %p1629_p8 = por %p1628_p6, %p1627_p3 }
  0x2c   : > { %p1630_p9 = pnand %p1629_p8, %p1623_p2 }
  0x2e   : > { %1633 = shalt.err (!%p1630_p9)
}
  0x2f   : > { %1517 = dma.hbm_to_vmem [thread:$0]  (!%p1806_p7), %s268_s28, 512, %s270_s30, %s259_s10, %s1691_s8, %s1691_s8, %s1692_s9  }
  0x30   : > { %281 = sbr.rel (%p1766_p5) target bundleno = 716 (0x2cc), region = 40  ;;  %s283_s14 = sand.u32 (!%p1766_p5), 1, %s1672_s19  }
  0x31   : > { %s1272_s15 = sshll.u32 (!%p1766_p5), %s283_s14, 5  ;;  %s284_s16 = scalar_lea.sflag (!%p1766_p5), [#allocation3], %s283_s14 }
  0x32   : > { %s1820_s24 = scalar_lea.vmem (!%p1766_p5), [#allocation2], %s1272_s15 }
  0x35   : > { %1659 = dma.done.wait (%p1762_p4), %s284_s16, 512  }
  0x36   : > { %1661 = vsyncadd (%p1762_p4), %s284_s16, 4294966784 }
  0x37   : > { %1663 = dma.done.wait (%p1754_p1), [#allocation5], 1536  }
  0x38   : > { %1665 = vsyncadd (%p1754_p1), [#allocation5], 4294965760  ;;  %p341_p5 = scmp.lt.s32.totalorder %s1680_s21, 7  ;;  %p372_p10 = scmp.eq.s32.totalorder %s1680_s21, 0 }
  0x39   : > { %v403_v0 = vld [vmem:[#allocation4 + $0x38] sm:$0xff] (%p372_p10)  ;;  %v402_v1 = vld [vmem:[#allocation4 + $0x30] sm:$0xff] (%p372_p10)  ;;  %v401_v2 = vld [vmem:[#allocation4 + $0x28] sm:$0xff] (%p372_p10)  ;;  %vm404_vm0 = vcmask (%p372_p10), 261120  }
  0x3a   : > { %s2091_s21 = smov (!%p341_p5, %s1680_s21), 7  ;;  %377 = sbr.rel (!%p372_p10) target bundleno = 290 (0x122), region = 52  ;;  %1496 = vmatprep.subr.mxu1 (%p372_p10), %v403_v0  ;;  %1400 = vmatprep.subr.mxu0 (%p372_p10), %v403_v0  ;;  %v400_v3 = vld [vmem:[#allocation4 + $0x20] sm:$0xff] (%p372_p10)  ;;  %v1282_v6 = vld [vmem:[%s2075_s3 + $0x68] sm:$0xff] (%p372_p10)  ;;  %v389_v7 = vld [vmem:[#allocation4 + $0x18] sm:$0xff] (%p372_p10) }
  0x3b   : > { %s1342_s27 = sshll.u32 %s2091_s21, 5  ;;  %1500 = vmatpush3.msra.mxu1 (%p372_p10), %v403_v0  ;;  %1401 = vmatpush3.msra.mxu0 (%p372_p10), %v403_v0  ;;  %v1281_v4 = vld [vmem:[%s2075_s3 + $0x60] sm:$0xff] (%p372_p10)  ;;  %v1278_v8 = vld [vmem:[%s2075_s3 + $0x48] sm:$0xff] (%p372_p10)  ;;  %v676_v9 = vld [vmem:[#allocation4 + $0x58] sm:$0xff] (%p372_p10) }
  0x3c   : > { %s1836_s28 = scalar_lea.vmem %s2072_s0, %s1342_s27  ;;  %1497 = vmatprep.subr.mxu1 (%p372_p10), %v402_v1  ;;  %1402 = vmatprep.subr.mxu0 (%p372_p10), %v402_v1  ;;  %v1277_v5 = vld [vmem:[%s2075_s3 + $0x40] sm:$0xff] (%p372_p10)  ;;  %v388_v10 = vld [vmem:[#allocation4 + $0x10] sm:$0xff] (%p372_p10)  ;;  %v1284_v14 = vld [vmem:[%s2075_s3 + $0x78] sm:$0xff] (%p372_p10) }
  0x3d   : > { %1501 = vmatpush3.msra.mxu1 (%p372_p10), %v402_v1  ;;  %1403 = vmatpush3.msra.mxu0 (%p372_p10), %v402_v1  ;;  %v1283_v11 = vld [vmem:[%s2075_s3 + $0x70] sm:$0xff] (%p372_p10)  ;;  %v387_v15 = vld [vmem:[#allocation4 + $0x8] sm:$0xff] (%p372_p10)  ;;  %v1280_v16 = vld [vmem:[%s2075_s3 + $0x58] sm:$0xff] (%p372_p10) }
  0x3e   : > { %1498 = vmatprep.subr.mxu1 (%p372_p10), %v401_v2  ;;  %1404 = vmatprep.subr.mxu0 (%p372_p10), %v401_v2  ;;  %v675_v12 = vld [vmem:[#allocation4 + $0x50] sm:$0xff] (%p372_p10)  ;;  %v674_v17 = vld [vmem:[#allocation4 + $0x48] sm:$0xff] (%p372_p10)  ;;  %v386_v18 = vld [vmem:[#allocation4] sm:$0xff] (%p372_p10) }
  0x3f   : > { %1502 = vmatpush3.msra.mxu1 %v401_v2  ;;  %1405 = vmatpush3.msra.mxu0 %v401_v2  ;;  %v1279_v13 = vld [vmem:[%s2075_s3 + $0x50] sm:$0xff]  ;;  %v378_v19 = vld [vmem:[%s2075_s3] sm:$0xff]  ;;  %v379_v21 = vld [vmem:[%s2075_s3 + $0x8] sm:$0xff] }
  0x40   : > { %1499 = vmatprep.subr.mxu1 %v400_v3  ;;  %1406 = vmatprep.subr.mxu0 %v400_v3  ;;  %v673_v20 = vld [vmem:[#allocation4 + $0x40] sm:$0xff]  ;;  %v380_v23 = vld [vmem:[%s2075_s3 + $0x10] sm:$0xff]  ;;  %v1302_v24 = vld [vmem:[%s2075_s3 + $0x88] sm:$0xff] }
  0x41   : > { %1503 = vmatpush3.msra.mxu1 %v400_v3  ;;  %1414 = vmatprep.mubr.msk.f32.mxu1 %vm404_vm0, %v1281_v4  ;;  %v1301_v22 = vld [vmem:[%s2075_s3 + $0x80] sm:$0xff]  ;;  %v1303_v25 = vld [vmem:[%s2075_s3 + $0x90] sm:$0xff]  ;;  %v381_v26 = vld [vmem:[%s2075_s3 + $0x18] sm:$0xff] }
  0x42   : > { %1407 = vmatpush3.msra.mxu0 %v400_v3  ;;  %1408 = vmatprep.mubr.msk.f32.mxu0 %vm404_vm0, %v1277_v5  ;;  %v382_v27 = vld [vmem:[%s2075_s3 + $0x20] sm:$0xff]  ;;  %v1304_v28 = vld [vmem:[%s2075_s3 + $0x98] sm:$0xff]  ;;  %v383_v30 = vld [vmem:[%s2075_s3 + $0x28] sm:$0xff] }
  0x43   : > { %1415 = vmatmul.mubr.msk.f32.vlgmr.msra.gmra.mxu1 %vm404_vm0, %v1282_v6  ;;  %1420 = vmatprep.subr.mxu1 %v389_v7  ;;  %v1305_v29 = vld [vmem:[%s2075_s3 + $0xa0] sm:$0xff]  ;;  %v384_v31 = vld [vmem:[%s2075_s3 + $0x30] sm:$0xff]  ;;  %v1306_v32 = vld [vmem:[%s2075_s3 + $0xa8] sm:$0xff] }
  0x44   : > { %1409 = vmatmul.mubr.msk.f32.vlgmr.msra.gmra.mxu0 %vm404_vm0, %v1278_v8  ;;  %1421 = vmatpush3.msra.mxu1 %v389_v7  ;;  %v1307_v33 = vld [vmem:[%s2075_s3 + $0xb0] sm:$0xff]  ;;  %v385_v34 = vld [vmem:[%s2075_s3 + $0x38] sm:$0xff] }
  0x45   : > { %1440 = vmatprep.subr.mxu0 %v676_v9  ;;  %1422 = vmatprep.subr.mxu1 %v388_v10  ;;  %v1308_v35 = vld [vmem:[%s2075_s3 + $0xb8] sm:$0xff] }
  0x46   : > { %1441 = vmatpush3.msra.mxu0 %v676_v9  ;;  %1417 = vmatprep.mubr.msk.f32.mxu1 %vm404_vm0, %v1283_v11 }
  0x47   : > { %1423 = vmatpush3.msra.mxu1 %v388_v10  ;;  %1442 = vmatprep.subr.mxu0 %v675_v12 }
  0x48   : > { %1411 = vmatprep.mubr.msk.f32.mxu0 %vm404_vm0, %v1279_v13  ;;  %1418 = vmatmul.mubr.msk.f32.gmra.mxu1 %vm404_vm0, %v1284_v14 }
  0x49   : > { %1424 = vmatprep.subr.mxu1 %v387_v15  ;;  %1443 = vmatpush3.msra.mxu0 %v675_v12 }
  0x4a   : > { %1412 = vmatmul.mubr.msk.f32.gmra.mxu0 %vm404_vm0, %v1280_v16  ;;  %1425 = vmatpush3.msra.mxu1 %v387_v15 }
  0x4b   : > { %1444 = vmatprep.subr.mxu0 %v674_v17  ;;  %1426 = vmatprep.subr.mxu1 %v386_v18 }
  0x4c   : > { %1445 = vmatpush3.msra.mxu0 %v674_v17  ;;  %1427 = vmatpush3.msra.mxu1 %v386_v18 }
  0x4d   : > { %1428 = vmatprep.mubr.msk.f32.mxu1 %vm404_vm0, %v378_v19  ;;  %1446 = vmatprep.subr.mxu0 %v673_v20 }
  0x4e   : > { %1429 = vmatmul.mubr.msk.f32.vlgmr.msra.gmra.mxu1 %vm404_vm0, %v379_v21  ;;  %1447 = vmatpush3.msra.mxu0 %v673_v20 }
  0x4f   : > { %1448 = vmatprep.mubr.msk.f32.mxu0 %vm404_vm0, %v1301_v22  ;;  %1431 = vmatprep.mubr.msk.f32.mxu1 %vm404_vm0, %v380_v23 }
  0x50   : > { %1449 = vmatmul.mubr.msk.f32.vlgmr.msra.gmra.mxu0 %vm404_vm0, %v1302_v24 }
  0x51   : > { %1451 = vmatprep.mubr.msk.f32.mxu0 %vm404_vm0, %v1303_v25 }
  0x52   : > { %1432 = vmatmul.mubr.msk.f32.gmra.mxu1 %vm404_vm0, %v381_v26 }
  0x53   : > { %1434 = vmatprep.mubr.msk.f32.mxu1 %vm404_vm0, %v382_v27 }
  0x54   : > { %1452 = vmatmul.mubr.msk.f32.gmra.mxu0 %vm404_vm0, %v1304_v28 }
  0x55   : > { %1454 = vmatprep.mubr.msk.f32.mxu0 %vm404_vm0, %v1305_v29 }
  0x56   : > { %1435 = vmatmul.mubr.msk.f32.gmra.mxu1 %vm404_vm0, %v383_v30 }
  0x57   : > { %1437 = vmatprep.mubr.msk.f32.mxu1 %vm404_vm0, %v384_v31 }
  0x58   : > { %1455 = vmatmul.mubr.msk.f32.gmra.mxu0 %vm404_vm0, %v1306_v32 }
  0x59   : > { %1457 = vmatprep.mubr.msk.f32.mxu0 %vm404_vm0, %v1307_v33 }
  0x5a   : > { %1438 = vmatmul.mubr.msk.f32.gmra.mxu1 %vm404_vm0, %v385_v34 }
  0x5c   : > { %1458 = vmatmul.mubr.msk.f32.gmra.mxu0 %vm404_vm0, %v1308_v35 }
 0x103   : > { %v1416_v36 = vpop.f32.mrf.mxu1 }
 0x104   : > { %v1410_v37 = vpop.f32.mrf.mxu0 }
 0x105   : > { %v515_v38 = vpop.f32.mrf.mxu1 }
 0x106   : > { %v495_v39 = vpop.f32.mrf.mxu0 }
 0x108   : > { %v1419_v40 = vpop.f32.mrf.mxu1 }
 0x10a   : > { %v1413_v41 = vpop.f32.mrf.mxu0  ;;  %v525_v42 = vpop.f32.mrf.mxu1 }
 0x10c   : > { %v505_v43 = vpop.f32.mrf.mxu0 }
 0x10e   : > { %v1430_v44 = vpop.f32.mrf.mxu1 }
 0x10f   : > { %v630_v45 = vadd.f32 %v1430_v44, %v1410_v37 }
 0x110   : > { %v1450_v46 = vpop.f32.mrf.mxu0  ;;  %v624_v47 = vpop.f32.mrf.mxu1 }
 0x111   : > { %v807_v48 = vadd.f32 %v1450_v46, %v630_v45  ;;  %v625_v49 = vadd.f32 %v624_v47, %v495_v39 }
 0x112   : > { %v767_v50 = vpop.f32.mrf.mxu0  ;;  %v1433_v51 = vpop.f32.mrf.mxu1 }
 0x113   : > { %815 = vst.msk [vmem:[%s2077_s5 + $0x8] sm:$0xff] %vm404_vm0, %v807_v48  ;;  %v806_v52 = vadd.f32 %v767_v50, %v625_v49  ;;  %v640_v53 = vadd.f32 %v1433_v51, %v1413_v41 }
 0x114   : > { %v1453_v54 = vpop.f32.mrf.mxu0  ;;  %v634_v55 = vpop.f32.mrf.mxu1 }
 0x115   : > { %814 = vst.msk [vmem:[%s2077_s5] sm:$0xff] %vm404_vm0, %v806_v52  ;;  %v809_v56 = vadd.f32 %v1453_v54, %v640_v53  ;;  %v635_v57 = vadd.f32 %v634_v55, %v505_v43 }
 0x116   : > { %v777_v58 = vpop.f32.mrf.mxu0  ;;  %v1436_v59 = vpop.f32.mrf.mxu1 }
 0x117   : > { %817 = vst.msk [vmem:[%s2077_s5 + $0x18] sm:$0xff] %vm404_vm0, %v809_v56  ;;  %v808_v60 = vadd.f32 %v777_v58, %v635_v57  ;;  %v650_v61 = vadd.f32 %v1436_v59, %v1416_v36 }
 0x118   : > { %v1456_v62 = vpop.f32.mrf.mxu0  ;;  %v644_v63 = vpop.f32.mrf.mxu1 }
 0x119   : > { %816 = vst.msk [vmem:[%s2077_s5 + $0x10] sm:$0xff] %vm404_vm0, %v808_v60  ;;  %v811_v0 = vadd.f32 %v1456_v62, %v650_v61  ;;  %v645_v1 = vadd.f32 %v644_v63, %v515_v38 }
 0x11a   : > { %v787_v2 = vpop.f32.mrf.mxu0  ;;  %v1439_v3 = vpop.f32.mrf.mxu1 }
 0x11b   : > { %819 = vst.msk [vmem:[%s2077_s5 + $0x28] sm:$0xff] %vm404_vm0, %v811_v0  ;;  %v810_v4 = vadd.f32 %v787_v2, %v645_v1  ;;  %v660_v5 = vadd.f32 %v1439_v3, %v1419_v40 }
 0x11c   : > { %v1459_v6 = vpop.f32.mrf.mxu0  ;;  %v654_v7 = vpop.f32.mrf.mxu1 }
 0x11d   : > { %818 = vst.msk [vmem:[%s2077_s5 + $0x20] sm:$0xff] %vm404_vm0, %v810_v4  ;;  %v813_v8 = vadd.f32 %v1459_v6, %v660_v5  ;;  %v655_v9 = vadd.f32 %v654_v7, %v525_v42 }
 0x11e   : > { %v797_v10 = vpop.f32.mrf.mxu0 }
 0x11f   : > { %821 = vst.msk [vmem:[%s2077_s5 + $0x38] sm:$0xff] %vm404_vm0, %v813_v8  ;;  %v812_v11 = vadd.f32 %v797_v10, %v655_v9 }
 0x121   : > { %820 = vst.msk [vmem:[%s2077_s5 + $0x30] sm:$0xff] %vm404_vm0, %v812_v11 }
 0x122 PF: > { %v1572_v12 = vld [vmem:[%s2073_s1 + $0x18] sm:$0xff]   ;;  %v1573_v13 = vld [vmem:[%s2073_s1 + $0x10] sm:$0xff]   ;;  %v1574_v14 = vld [vmem:[%s2073_s1 + $0x8] sm:$0xff]   ;;  %vm889_vm1 = vcmask 523264   ;;  %vm979_vm2 = vcmask 261120  }
 0x123   : > { %1460 = vmatprep.subr.bf16.mxu0 %v1572_v12  ;;  %v1576_v15 = vld [vmem:[%s1836_s28] sm:$0xff]   ;;  %v978_v17 = vld [vmem:[%s1820_s24 + $0x18] sm:$0xff]  ;;  %v1577_v18 = vld [vmem:[%s1836_s28 + $0x8] sm:$0xff]  }
 0x124   : > { %1461 = vmatpush3.bf16.msra.mxu0 %v1572_v12  ;;  %1468 = vmatprep.mubr.msk.bf16.mxu0 %vm889_vm1, %v1576_v15  ;;  %v1575_v16 = vld [vmem:[%s2073_s1] sm:$0xff]   ;;  %v1578_v19 = vld [vmem:[%s1836_s28 + $0x10] sm:$0xff]   ;;  %v1579_v20 = vld [vmem:[%s1836_s28 + $0x18] sm:$0xff]  }
 0x125   : > { %1462 = vmatprep.subr.bf16.mxu0 %v1573_v13  ;;  %1476 = vmatprep.subr.mxu1 %v978_v17  ;;  %v977_v21 = vld [vmem:[%s1820_s24 + $0x10] sm:$0xff]  ;;  %v976_v22 = vld [vmem:[%s1820_s24 + $0x8] sm:$0xff]  ;;  %v975_v23 = vld [vmem:[%s1820_s24] sm:$0xff] }
 0x126   : > { %1477 = vmatpush3.msra.mxu1 %v978_v17  ;;  %v968_v32 = vld [vmem:[%s2077_s5 + $0x8] sm:$0xff]  ;;  %v967_v34 = vld [vmem:[%s2077_s5] sm:$0xff]  ;;  %v970_v37 = vld [vmem:[%s2077_s5 + $0x18] sm:$0xff] }
 0x127   : > { %1478 = vmatprep.subr.mxu1 %v977_v21  ;;  %v969_v40 = vld [vmem:[%s2077_s5 + $0x10] sm:$0xff]  ;;  %v972_v43 = vld [vmem:[%s2077_s5 + $0x28] sm:$0xff]  ;;  %v971_v46 = vld [vmem:[%s2077_s5 + $0x20] sm:$0xff] }
 0x128   : > { %1463 = vmatpush3.bf16.msra.mxu0 %v1573_v13  ;;  %1479 = vmatpush3.msra.mxu1 %v977_v21  ;;  %v974_v49 = vld [vmem:[%s2077_s5 + $0x38] sm:$0xff]  ;;  %v973_v52 = vld [vmem:[%s2077_s5 + $0x30] sm:$0xff] }
 0x129   : > { %1464 = vmatprep.subr.bf16.mxu0 %v1574_v14  ;;  %1480 = vmatprep.subr.mxu1 %v976_v22 }
 0x12a   : > { %1481 = vmatpush3.msra.mxu1 %v976_v22 }
 0x12b   : > { %1482 = vmatprep.subr.mxu1 %v975_v23 }
 0x12c   : > { %1465 = vmatpush3.bf16.msra.mxu0 %v1574_v14  ;;  %1483 = vmatpush3.msra.mxu1 %v975_v23 }
 0x12d   : > { %1466 = vmatprep.subr.bf16.mxu0 %v1575_v16 }
 0x130   : > { %1467 = vmatpush3.bf16.msra.mxu0 %v1575_v16 }
 0x133   : > { %1469 = vmatmul.mubr.msk.bf16.vlgmr.msra.gmra.mxu0 %vm889_vm1, %v1577_v18 }
 0x134   : > { %1472 = vmatprep.mubr.msk.bf16.mxu0 %vm889_vm1, %v1578_v19 }
 0x13b   : > { %1473 = vmatmul.mubr.msk.bf16.gmra.mxu0 %vm889_vm1, %v1579_v20 }
 0x1f3   : > { %v1470_v24 = vpop.f32.mrf.mxu0 }
 0x1f5   : > { %v936_v25 = vpop.f32.mrf.mxu0 }
 0x1f6   : > { %1484 = vmatprep.mubr.msk.f32.mxu1 %vm979_vm2, %v936_v25 }
 0x1f7   : > { %v1471_v26 = vpop.f32.mrf.mxu0 }
 0x1f9   : > { %v939_v27 = vpop.f32.mrf.mxu0 }
 0x1fa   : > { %1485 = vmatmul.mubr.msk.f32.vlgmr.msra.gmra.mxu1 %vm979_vm2, %v939_v27 }
 0x1fb   : > { %v1474_v28 = vpop.f32.mrf.mxu0  ;;  %1487 = vmatprep.mubr.msk.f32.mxu1 %vm979_vm2, %v1470_v24 }
 0x1fd   : > { %v952_v29 = vpop.f32.mrf.mxu0 }
 0x1fe   : > { %1488 = vmatmul.mubr.msk.f32.gmra.mxu1 %vm979_vm2, %v1471_v26 }
 0x1ff   : > { %v1475_v30 = vpop.f32.mrf.mxu0  ;;  %1490 = vmatprep.mubr.msk.f32.mxu1 %vm979_vm2, %v952_v29 }
 0x201   : > { %v955_v31 = vpop.f32.mrf.mxu0 }
 0x202   : > { %1491 = vmatmul.mubr.msk.f32.gmra.mxu1 %vm979_vm2, %v955_v31 }
 0x203   : > { %1493 = vmatprep.mubr.msk.f32.mxu1 %vm979_vm2, %v1474_v28 }
 0x206   : > { %1494 = vmatmul.mubr.msk.f32.gmra.mxu1 %vm979_vm2, %v1475_v30 }
 0x2ba   : > { %v1486_v33 = vpop.f32.mrf.mxu1 }
 0x2bb   : > { %v1110_v35 = vadd.f32 %v1486_v33, %v968_v32 }
 0x2bc   : > { %v1070_v36 = vpop.f32.mrf.mxu1 }
 0x2bd   : > { %1118 = vst.msk [vmem:[%s2077_s5 + $0x8] sm:$0xff] %vm979_vm2, %v1110_v35  ;;  %v1109_v38 = vadd.f32 %v1070_v36, %v967_v34 }
 0x2be   : > { %v1489_v39 = vpop.f32.mrf.mxu1 }
 0x2bf   : > { %1117 = vst.msk [vmem:[%s2077_s5] sm:$0xff] %vm979_vm2, %v1109_v38  ;;  %v1112_v41 = vadd.f32 %v1489_v39, %v970_v37 }
 0x2c0   : > { %v1080_v42 = vpop.f32.mrf.mxu1 }
 0x2c1   : > { %1120 = vst.msk [vmem:[%s2077_s5 + $0x18] sm:$0xff] %vm979_vm2, %v1112_v41  ;;  %v1111_v44 = vadd.f32 %v1080_v42, %v969_v40 }
 0x2c2   : > { %v1492_v45 = vpop.f32.mrf.mxu1 }
 0x2c3   : > { %1119 = vst.msk [vmem:[%s2077_s5 + $0x10] sm:$0xff] %vm979_vm2, %v1111_v44  ;;  %v1114_v47 = vadd.f32 %v1492_v45, %v972_v43 }
 0x2c4   : > { %v1090_v48 = vpop.f32.mrf.mxu1 }
 0x2c5   : > { %1122 = vst.msk [vmem:[%s2077_s5 + $0x28] sm:$0xff] %vm979_vm2, %v1114_v47  ;;  %v1113_v50 = vadd.f32 %v1090_v48, %v971_v46 }
 0x2c6   : > { %v1495_v51 = vpop.f32.mrf.mxu1 }
 0x2c7   : > { %1121 = vst.msk [vmem:[%s2077_s5 + $0x20] sm:$0xff] %vm979_vm2, %v1113_v50  ;;  %v1116_v53 = vadd.f32 %v1495_v51, %v974_v49 }
 0x2c8   : > { %v1100_v54 = vpop.f32.mrf.mxu1 }
 0x2c9   : > { %1124 = vst.msk [vmem:[%s2077_s5 + $0x38] sm:$0xff] %vm979_vm2, %v1116_v53  ;;  %v1115_v55 = vadd.f32 %v1100_v54, %v973_v52 }
 0x2cb   : > { %1123 = vst.msk [vmem:[%s2077_s5 + $0x30] sm:$0xff] %vm979_vm2, %v1115_v55 }
 0x2cc PF: > { %s19_s23 = sadd.s32 1, %s1688_s23   ;;  %s2083_s18 = smov %s1672_s19 }
 0x2cd   : > { %p16_p1 = scmp.ge.s32.totalorder %s19_s23, 10   ;;  %s2084_s19 = smov %s1676_s20 }
 0x2ce   : > { %s2085_s20 = smov %s1801_s17  ;;  %s2086_s21 = smov %s1684_s22 }
 0x2cf   : > { %s2087_s22 = smov %s2089_s6  ;;  %18 = sbr.rel (!%p16_p1) target bundleno = 5 (0x5), region = 105 }
 0x2d4   :  { %1147 = vsyncpa [#allocation3], 1 }
 0x2d5   :  { %1149 = vsyncpa [#allocation3 + $0x1], 1 }
 0x2d6   :  { %1150 = vsyncpa [#allocation5], 1 }

</bundles_post_ra>
